<compile_context>
chip_gen: v6e
topology: v6e:2x2x1
jax: 0.10.0
libtpu: 0.0.40
codegen_flags: <defaults>
</compile_context>

<pallas_src>
import jax
import jax.numpy as jnp
from jax.experimental import pallas as pl
from jax.experimental.pallas import tpu as pltpu


def _round_up(x: int, m: int) -> int:
    return (x + m - 1) // m * m


# ----------------------------- Pallas kernel --------------------------------
def _proj_kernel(x_ref, wt_ref, o_ref):
    # x_ref:  (tm, Ep)  row tile of the flattened, padded (Mp, Ep) embeddings
    # wt_ref: (Ep, tn)  column tile of the padded, pre-transposed weight
    # o_ref:  (tm, tn)  output tile (lane-dense: tn is a multiple of 128)
    o_ref[...] = jnp.dot(
        x_ref[...], wt_ref[...], preferred_element_type=jnp.float32
    ).astype(o_ref.dtype)


def text_embed_proj(text_embeds: jax.Array, wt_padded: jax.Array, dim_out: int,
                    *, tm: int = 256, tn: int = 512):
    """Bias-free linear projection over the last axis (PyTorch nn.Linear).

    text_embeds: [B, L, E]
    wt_padded:   [Ep, Dp]   pre-transposed, zero-padded weight (built in init)
    dim_out:     D          unpadded output dim
    returns:     [B, L, D]  in text_embeds.dtype
    """
    B, L, E = text_embeds.shape
    Ep, Dp = wt_padded.shape

    M = B * L
    x2d = text_embeds.reshape(M, E)

    # Zero-pad the contraction dim; padded K columns contribute nothing.
    if Ep != E:
        x2d = jnp.pad(x2d, ((0, 0), (0, Ep - E)))

    # Row tile: one big block when small (sublane-aligned), 256-row tiles
    # otherwise. Pad M instead of asserting divisibility.
    tm_eff = min(tm, _round_up(M, 8))
    Mp = _round_up(M, tm_eff)
    if Mp != M:
        x2d = jnp.pad(x2d, ((0, Mp - M), (0, 0)))

    # Output-column tile: lane-dense (multiple of 128), single block when small.
    if Dp <= tn:
        tn_eff = Dp
    elif Dp % tn == 0:
        tn_eff = tn
    else:
        tn_eff = 128  # Dp is always a multiple of 128

    # N outer, M inner: the weight block index (0, j) is constant across the
    # inner M loop, so Pallas keeps the weight tile resident (O(1) HBM traffic
    # per output column tile instead of O(M/tm)).
    grid = (Dp // tn_eff, Mp // tm_eff)

    compute_dtype = x2d.dtype
    itemsize = jnp.dtype(compute_dtype).itemsize
    cost = pl.CostEstimate(
        flops=2 * Mp * Ep * Dp,
        bytes_accessed=itemsize * (Mp * Ep + Ep * Dp + Mp * Dp),
        transcendentals=0,
    )

    out2d = pl.pallas_call(
        _proj_kernel,
        out_shape=jax.ShapeDtypeStruct((Mp, Dp), compute_dtype),
        grid_spec=pltpu.PrefetchScalarGridSpec(
            num_scalar_prefetch=0,
            grid=grid,
            in_specs=[
                pl.BlockSpec((tm_eff, Ep), lambda j, i: (i, 0)),
                pl.BlockSpec((Ep, tn_eff), lambda j, i: (0, j)),
            ],
            out_specs=pl.BlockSpec((tm_eff, tn_eff), lambda j, i: (i, j)),
        ),
        compiler_params=pltpu.CompilerParams(
            dimension_semantics=("parallel", "parallel"),
        ),
        cost_estimate=cost,
    )(x2d, wt_padded.astype(compute_dtype))

    return out2d[:M, :dim_out].reshape(B, L, dim_out)


# ---------------------- synthetic deterministic "T5" -------------------------
def synthetic_t5_encoder(texts, max_length: int, text_embed_dim: int, key):
    """Deterministic stand-in for T5Encoder(texts) -> (context_mask, text_embeds).

    context_mask: [B, L] bool   (True for "real" token positions)
    text_embeds:  [B, L, E] float32
    """
    B = len(texts)
    L = max_length
    lengths = jnp.array(
        [min(len(t.split()), L) for t in texts], dtype=jnp.int32
    )
    pos = jnp.arange(L, dtype=jnp.int32)[None, :]  # [1, L]
    context_mask = pos < lengths[:, None]          # [B, L] bool

    embeds = jax.random.normal(key, (B, L, text_embed_dim), dtype=jnp.float32)
    # zero out padded positions (as a masked encoder would)
    embeds = embeds * context_mask[..., None].astype(jnp.float32)
    return context_mask, embeds


# ------------------------------ TextEncoder ----------------------------------
class TextEncoder:
    def __init__(self, dim: int, text_embed_dim: int, max_length: int, key,
                 compute_dtype=jnp.float32):
        self.dim = dim
        self.max_length = max_length
        self.text_embed_dim = text_embed_dim
        self.compute_dtype = compute_dtype
        k_w, self.k_t5 = jax.random.split(key)

        # nn.Linear(text_embed_dim, dim, bias=False) -> weight [dim, text_embed_dim]
        bound = 1.0 / (text_embed_dim ** 0.5)
        self.proj_weight = jax.random.uniform(
            k_w, (dim, text_embed_dim), minval=-bound, maxval=bound,
            dtype=jnp.float32,
        )

        # Hoisted out of the per-call path: transpose + lane-pad the weight ONCE.
        Ep = _round_up(text_embed_dim, 128)
        Dp = _round_up(dim, 128)
        wt = self.proj_weight.T  # [E, D]
        self.wt_padded = jnp.pad(
            wt, ((0, Ep - text_embed_dim), (0, Dp - dim))
        ).astype(compute_dtype)

    def __call__(self, texts):
        context_mask, text_embeds = synthetic_t5_encoder(
            texts, self.max_length, self.text_embed_dim, self.k_t5
        )
        proj = text_embed_proj(
            text_embeds.astype(self.compute_dtype), self.wt_padded, self.dim
        )
        return context_mask, proj


# ---------------------------------- main -------------------------------------
if __name__ == "__main__":
    key = jax.random.PRNGKey(0)

    dim = 32               # output projection dim
    text_embed_dim = 64    # stand-in for get_encoded_dim(t5_name)
    max_length = 8         # sequence length
    texts = [
        "a photo of a cat sitting on a mat",
        "dog running",
    ]

    enc = TextEncoder(dim, text_embed_dim, max_length, key)
    context_mask, text_embeds = enc(texts)
    jax.block_until_ready(text_embeds)
    jax.block_until_ready(context_mask)

    # sanity: compare against plain-JAX reference of the projection
    _, raw_embeds = synthetic_t5_encoder(texts, max_length, text_embed_dim, enc.k_t5)
    ref = jnp.einsum("ble,de->bld", raw_embeds, enc.proj_weight)
    assert context_mask.shape == (len(texts), max_length)
    assert text_embeds.shape == (len(texts), max_length, dim)
    assert jnp.allclose(text_embeds, ref, atol=1e-5, rtol=1e-5)

    print("KERNEL_OK")
</pallas_src>

<mosaic_0001>
module attributes {stable_mosaic.version = 11 : i64} {
  func.func @_proj_kernel(%arg0: i32, %arg1: i32, %arg2: memref<16x128xf32, #tpu.memory_space<vmem>>, %arg3: memref<128x128xf32, #tpu.memory_space<vmem>>, %arg4: memref<16x128xf32, #tpu.memory_space<vmem>>) attributes {dimension_semantics = [#tpu.dimension_semantics<parallel>, #tpu.dimension_semantics<parallel>], iteration_bounds = array<i64: 1, 1>, scalar_prefetch = 0 : i64, scratch_operands = 0 : i64, tpu.core_type = #tpu.core_type<tc>, window_params = [{transform_indices = @transform_0, window_bounds = array<i64: 16, 128>}, {transform_indices = @transform_1, window_bounds = array<i64: 128, 128>}, {transform_indices = @transform_2, window_bounds = array<i64: 16, 128>}]} {
    %c0 = arith.constant 0 : index
    %c0_0 = arith.constant 0 : index
    %0 = vector.load %arg2[%c0, %c0_0] : memref<16x128xf32, #tpu.memory_space<vmem>>, vector<16x128xf32>
    %c0_1 = arith.constant 0 : index
    %c0_2 = arith.constant 0 : index
    %1 = vector.load %arg3[%c0_1, %c0_2] : memref<128x128xf32, #tpu.memory_space<vmem>>, vector<128x128xf32>
    %cst = arith.constant dense<0.000000e+00> : vector<16x128xf32>
    %2 = tpu.matmul %0, %1, %cst {dimension_numbers = #tpu.dot_dimension_numbers<[1], [0], [0], [1], [0, 0, 1, 1], [], []>} : vector<16x128xf32>, vector<128x128xf32>, vector<16x128xf32> -> vector<16x128xf32>
    %c0_3 = arith.constant 0 : index
    %c0_4 = arith.constant 0 : index
    %3 = vector.load %arg4[%c0_3, %c0_4] : memref<16x128xf32, #tpu.memory_space<vmem>>, vector<16x128xf32>
    tpu.vector_store %arg4[%c0_3, %c0_4], %2 {strides = array<i32>} : memref<16x128xf32, #tpu.memory_space<vmem>>, vector<16x128xf32>,
    return
  }
  func.func @transform_0(%arg0: i32, %arg1: i32) -> (i32, i32) {
    %c0_i32 = arith.constant 0 : i32
    %c0_i32_0 = arith.constant 0 : i32
    return %arg1, %c0_i32 : i32, i32
  }
  func.func @transform_1(%arg0: i32, %arg1: i32) -> (i32, i32) {
    %c0_i32 = arith.constant 0 : i32
    %c0_i32_0 = arith.constant 0 : i32
    return %c0_i32, %arg0 : i32, i32
  }
  func.func @transform_2(%arg0: i32, %arg1: i32) -> (i32, i32) {
    %c0_i32 = arith.constant 0 : i32
    return %arg1, %arg0 : i32, i32
  }
}

</mosaic_0001>

<bundles_post_ra>
// kernel: tpu_custom_call.1
= control target key start
LH: loop header
LB: loop body
LE: loop exit
PB: predicated region body
PF: predicated region fallthrough
CT: control target
= control target key end

     0   :  { %7 = vsyncpa [#allocation3], 0  ;;  %s315_s0 = inlined_call_operand.hbm [shape: f32[16,128], index: 0, kind: input, shape index: {}]   ;;  %s316_s1 = inlined_call_operand.hbm [shape: f32[128,128], index: 1, kind: input, shape index: {}]   ;;  %s317_s2 = inlined_call_operand.hbm [shape: f32[16,128], index: 2, kind: output, shape index: {}]  }
   0x1   :  { %8 = vsyncpa [#allocation6], 0 }
   0x2   :  { %9 = vsyncpa [#allocation4], 0  ;;  %s277_s9 = smov [#allocation2]  }
   0x3   :  { %s15_s10 = sshll.u32 %s277_s9, 4  ;;  %s16_s10 = int_to_ptr.vmem [resolvable:$true] %s15_s10 }
   0x4   :  { %s219_s11 = scalar_lea.vmem %s16_s10, 256  ;;  %p224_p1 = scmp.lt.s32.totalorder %s16_s10, %s16_s10 }
   0x5   :  { %p220_p0 = scmp.ne.s32.totalorder %s16_s10, %s219_s11  ;;  %p225_p2 = scmp.lt.s32.totalorder %s219_s11, %s219_s11 }
   0x7   :  { %p226_p3 = por %p225_p2, %p224_p1 }
   0x9   :  { %p227_p4 = pnand %p226_p3, %p220_p0 }
   0xb   :  { %230 = shalt.err (!%p227_p4)
}
   0xc   :  { %s278_s12 = smov 128   ;;  %s279_s13 = smov 8  }
   0xd   :  { %21 = dma.hbm_to_vmem [thread:$0]  %s315_s0, 256, %s16_s10, [#allocation3], %s278_s12, %s278_s12, %s279_s13  }
   0xe   :  { %s280_s16 = smov [#allocation5]  }
   0xf   :  { %s27_s17 = sshll.u32 %s280_s16, 4  ;;  %s28_s17 = int_to_ptr.vmem [resolvable:$true] %s27_s17 }
  0x10   :  { %s239_s18 = scalar_lea.vmem %s28_s17, 2048  ;;  %p244_p6 = scmp.lt.s32.totalorder %s28_s17, %s28_s17 }
  0x11   :  { %p240_p5 = scmp.ne.s32.totalorder %s28_s17, %s239_s18  ;;  %p245_p7 = scmp.lt.s32.totalorder %s239_s18, %s239_s18 }
  0x13   :  { %p246_p8 = por %p245_p7, %p244_p6 }
  0x15   :  { %p247_p9 = pnand %p246_p8, %p240_p5 }
  0x17   :  { %250 = shalt.err (!%p247_p9)
}
  0x18   :  { %33 = dma.hbm_to_vmem [thread:$0]  %s316_s1, 2048, %s28_s17, [#allocation6], %s278_s12, %s278_s12, %s279_s13  }
  0x19   :  { %271 = dma.done.wait [#allocation3], 256  }
  0x1a   :  { %272 = vsyncadd [#allocation3], 4294967040 }
  0x1b   :  { %273 = dma.done.wait [#allocation6], 2048  }
  0x1c   :  { %274 = vsyncadd [#allocation6], 4294965248  ;;  %v57_v0 = vld [vmem:[#allocation5 + $0x78] sm:$0xff]  ;;  %v56_v1 = vld [vmem:[#allocation5 + $0x70] sm:$0xff]  ;;  %s281_s0 = smov [#allocation7]  }
  0x1d   :  { %171 = vmatprep.subr.mxu0 %v57_v0  ;;  %v55_v2 = vld [vmem:[#allocation5 + $0x68] sm:$0xff]  ;;  %v54_v3 = vld [vmem:[#allocation5 + $0x60] sm:$0xff]  ;;  %v40_v4 = vld [vmem:[#allocation2] sm:$0xff]  ;;  %s140_s1 = sshll.u32 %s281_s0, 4  ;;  %s141_s1 = int_to_ptr.vmem [resolvable:$true] %s140_s1 }
  0x1e   :  { %172 = vmatpush3.msra.mxu0 %v57_v0  ;;  %v53_v5 = vld [vmem:[#allocation5 + $0x58] sm:$0xff]  ;;  %203 = vmatprep.mubr.f32.mxu0 %v40_v4  ;;  %v52_v6 = vld [vmem:[#allocation5 + $0x50] sm:$0xff]  ;;  %v51_v7 = vld [vmem:[#allocation5 + $0x48] sm:$0xff]  ;;  %s251_s21 = scalar_lea.vmem %s141_s1, 256  ;;  %p256_p11 = scmp.lt.s32.totalorder %s141_s1, %s141_s1 }
  0x1f   :  { %173 = vmatprep.subr.mxu0 %v56_v1  ;;  %v50_v8 = vld [vmem:[#allocation5 + $0x40] sm:$0xff]  ;;  %v49_v9 = vld [vmem:[#allocation5 + $0x38] sm:$0xff]  ;;  %v48_v10 = vld [vmem:[#allocation5 + $0x30] sm:$0xff]  ;;  %p252_p10 = scmp.ne.s32.totalorder %s141_s1, %s251_s21  ;;  %p257_p12 = scmp.lt.s32.totalorder %s251_s21, %s251_s21 }
  0x20   :  { %174 = vmatpush3.msra.mxu0 %v56_v1  ;;  %v47_v11 = vld [vmem:[#allocation5 + $0x28] sm:$0xff]  ;;  %v46_v12 = vld [vmem:[#allocation5 + $0x20] sm:$0xff]  ;;  %v45_v13 = vld [vmem:[#allocation5 + $0x18] sm:$0xff] }
  0x21   :  { %175 = vmatprep.subr.mxu0 %v55_v2  ;;  %v44_v14 = vld [vmem:[#allocation5 + $0x10] sm:$0xff]  ;;  %v43_v15 = vld [vmem:[#allocation5 + $0x8] sm:$0xff]  ;;  %v42_v16 = vld [vmem:[#allocation5] sm:$0xff]  ;;  %p258_p13 = por %p257_p12, %p256_p11 }
  0x22   :  { %176 = vmatpush3.msra.mxu0 %v55_v2  ;;  %v41_v17 = vld [vmem:[#allocation2 + $0x8] sm:$0xff] }
  0x23   :  { %177 = vmatprep.subr.mxu0 %v54_v3  ;;  %p259_p0 = pnand %p258_p13, %p252_p10 }
  0x24   :  { %178 = vmatpush3.msra.mxu0 %v54_v3 }
  0x25   :  { %179 = vmatprep.subr.mxu0 %v53_v5 }
  0x26   :  { %180 = vmatpush3.msra.mxu0 %v53_v5 }
  0x27   :  { %181 = vmatprep.subr.mxu0 %v52_v6 }
  0x28   :  { %182 = vmatpush3.msra.mxu0 %v52_v6 }
  0x29   :  { %183 = vmatprep.subr.mxu0 %v51_v7 }
  0x2a   :  { %184 = vmatpush3.msra.mxu0 %v51_v7 }
  0x2b   :  { %185 = vmatprep.subr.mxu0 %v50_v8 }
  0x2c   :  { %186 = vmatpush3.msra.mxu0 %v50_v8 }
  0x2d   :  { %187 = vmatprep.subr.mxu0 %v49_v9 }
  0x2e   :  { %188 = vmatpush3.msra.mxu0 %v49_v9 }
  0x2f   :  { %189 = vmatprep.subr.mxu0 %v48_v10 }
  0x30   :  { %190 = vmatpush3.msra.mxu0 %v48_v10 }
  0x31   :  { %191 = vmatprep.subr.mxu0 %v47_v11 }
  0x32   :  { %192 = vmatpush3.msra.mxu0 %v47_v11 }
  0x33   :  { %193 = vmatprep.subr.mxu0 %v46_v12 }
  0x34   :  { %194 = vmatpush3.msra.mxu0 %v46_v12 }
  0x35   :  { %195 = vmatprep.subr.mxu0 %v45_v13 }
  0x36   :  { %196 = vmatpush3.msra.mxu0 %v45_v13 }
  0x37   :  { %197 = vmatprep.subr.mxu0 %v44_v14 }
  0x38   :  { %198 = vmatpush3.msra.mxu0 %v44_v14 }
  0x39   :  { %199 = vmatprep.subr.mxu0 %v43_v15 }
  0x3a   :  { %200 = vmatpush3.msra.mxu0 %v43_v15 }
  0x3b   :  { %201 = vmatprep.subr.mxu0 %v42_v16 }
  0x3c   :  { %202 = vmatpush3.msra.mxu0 %v42_v16 }
  0x3d   :  { %204 = vmatmul.mubr.f32.vlgmr.msra.gmra.mxu0 %v41_v17 }
  0xfd   :  { %v205_v18 = vpop.f32.mrf.mxu0 }
  0xfe   :  { %134 = vst [vmem:[#allocation7 + $0x8] sm:$0xff] %v205_v18 }
  0xff   :  { %v124_v19 = vpop.f32.mrf.mxu0 }
 0x100   :  { %133 = vst [vmem:[#allocation7] sm:$0xff] %v124_v19 }
 0x101   :  { %262 = shalt.err (!%p259_p0)
}
 0x102   :  { %146 = dma.vmem_to_hbm [thread:$0]  %s141_s1, 256, %s317_s2, [#allocation4], %s278_s12, %s278_s12, %s279_s13  }
 0x103   :  { %275 = dma.done.wait [#allocation4], 256  }
 0x104   :  { %276 = vsyncadd [#allocation4], 4294967040 }
 0x105   :  { %150 = vsyncpa [#allocation3], 1 }
 0x106   :  { %151 = vsyncpa [#allocation6], 1 }
 0x107   :  { %152 = vsyncpa [#allocation4], 1 }

</bundles_post_ra>
